<compile_context>
chip_gen: v5e
topology: v5e:2x2
jax: 0.10.0
libtpu: 0.0.40
codegen_flags: <defaults>
</compile_context>

<pallas_src>
import functools

import jax
import jax.numpy as jnp
from jax import lax
from jax.experimental import pallas as pl
from jax.experimental.pallas import tpu as pltpu

_LANE = 128
_SUBLANE = 8


def _cinet_kernel(x_ref, m_ref, o_ref, acc_ref, *, kn, s_blk, sa_chunks, ncs):
    """One K step of  out[j, b] = sum_d m_comb[j, d] * x[b, d]  (VPU formulation).

    x_ref  : (B, S_BLK, 128)  lane-dense tile of the flattened input (native dtype)
    m_ref  : (2, S_BLK, 128)  lane-dense tile of the combined mask  W @ (10 * masks)
    o_ref  : (1, 2, B)        per-core-split partial result, written on the last K step
    acc_ref: (2, B, 128)      f32 lane-wide running partial sums (VMEM scratch)
    """
    c = pl.program_id(0)                       # core-split index ("parallel")
    k = pl.program_id(1)                       # K-reduction index ("arbitrary")

    @pl.when(k == 0)
    def _():
        acc_ref[...] = jnp.zeros_like(acc_ref)

    xv = x_ref[...].astype(jnp.float32)        # in-kernel upcast; no wrapper copy
    mv = m_ref[...]                            # (2, S_BLK, 128), f32

    def accumulate(valid):
        # Static unroll over the 2 mask rows: pure VPU mul + sublane-reduce adds.
        # (An N=2 MXU matmul would reload MXU weights every 128/256-wide K chunk.)
        for r in range(2):
            prod = xv * mv[r]                  # (B, S_BLK, 128)
            if valid is not None:
                prod = jnp.where(valid, prod, 0.0)
            acc_ref[r] += jnp.sum(prod, axis=1)          # (B, 128)

    n_full = sa_chunks // s_blk                # K blocks fully inside valid data
    if ncs * kn * s_blk == sa_chunks:
        accumulate(None)                       # every block fully valid: no mask code
    else:
        gidx = c * kn + k                      # global K-block index

        @pl.when(gidx < n_full)
        def _():
            accumulate(None)

        @pl.when(gidx >= n_full)               # ragged / padding blocks only
        def _():
            chunk = gidx * s_blk + lax.broadcasted_iota(jnp.int32, xv.shape, 1)
            accumulate(chunk < sa_chunks)      # mask the product: OOB garbage is safe

    @pl.when(k == kn - 1)
    def _():
        # Single cross-lane reduce per K sweep; bias is folded into the wrapper.
        o_ref[0] = jnp.sum(acc_ref[...], axis=-1)        # (2, B)


def cinetv3_prepare_params(masks, w, b):
    """Fold the x10 mask scale and the 2x2 classifier weight into one matrix,
    once at parameter-load time:  y = x @ (W @ (10*M))^T + b.

    Returns kernel-ready pieces:
      m_kernel: (2, D//128, 128) f32  lane-dense combined mask (128-aligned prefix)
      m_tail:   (2, D %  128)    f32  sub-128 remainder (handled in the wrapper)
      bias:     (2,)             f32
    """
    m_flat = masks.reshape(2, -1).astype(jnp.float32)            # (2, D)
    m_comb = jnp.dot(w.astype(jnp.float32), m_flat * 10.0)       # (2, D), tiny
    d = m_comb.shape[1]
    sa = d // _LANE
    m_kernel = m_comb[:, : sa * _LANE].reshape(2, sa, _LANE)
    m_tail = m_comb[:, sa * _LANE:]
    return m_kernel, m_tail, b.reshape(-1).astype(jnp.float32)


def cinetv3_forward(x, m_kernel, m_tail, bias, *,
                    buffer_budget_bytes=12 << 20,   # v5e/v6e/v7x-safe buffer total
                    vmem_limit_bytes=32 << 20,
                    num_core_splits=2):
    """x: (B, ...) with prod(...) == D. Returns (B, 2) f32 logits."""
    b_sz = x.shape[0]
    x_flat = x.reshape(b_sz, -1)                     # native dtype, no upcast copy
    d = x_flat.shape[1]
    sa = m_kernel.shape[1]                           # number of full 128-lane chunks
    assert d == sa * _LANE + m_tail.shape[1], "masks / x shape mismatch"

    # Sub-128 remainder of D: tiny XLA contraction (avoids padding or copying x).
    tail = None
    if m_tail.shape[1] > 0:
        tail = jnp.dot(x_flat[:, sa * _LANE:].astype(jnp.float32), m_tail.T)   # (B, 2)

    if sa == 0:
        y = tail
    else:
        # Metadata-only reshape when D is 128-aligned (the shipped case).
        x3 = x_flat[:, : sa * _LANE].reshape(b_sz, sa, _LANE)

        # K-tile sizing with real VMEM accounting: 2x double-buffered x tile
        # (B rows) + 2x double-buffered mask tile (2 rows), all lane-dense.
        per_chunk = 2 * (b_sz + 2) * _LANE * 4       # buffered bytes per 128-chunk of K
        s_max = max(_SUBLANE,
                    (buffer_budget_bytes // per_chunk) // _SUBLANE * _SUBLANE)
        s_blk = sa if sa <= s_max else s_max         # chunks per K block
        n_blocks = pl.cdiv(sa, s_blk)

        # Leading "parallel" axis: splits the K range across v7x's 2 TensorCores
        # (two partial sums added below); a plain sequential loop on 1-TC chips.
        ncs = num_core_splits if n_blocks >= 2 else 1
        kn = pl.cdiv(n_blocks, ncs)

        def in_map(c, k):
            # Clamp so padding steps revisit the last real block (no extra DMA and
            # no fully-OOB reads); their contribution is masked to zero in-kernel.
            return (0, jnp.minimum(c * kn + k, n_blocks - 1), 0)

        kernel = functools.partial(_cinet_kernel, kn=kn, s_blk=s_blk,
                                   sa_chunks=sa, ncs=ncs)
        partial_out = pl.pallas_call(
            kernel,
            out_shape=jax.ShapeDtypeStruct((ncs, 2, b_sz), jnp.float32),
            grid_spec=pltpu.PrefetchScalarGridSpec(
                num_scalar_prefetch=0,
                grid=(ncs, kn),
                in_specs=[
                    pl.BlockSpec((b_sz, s_blk, _LANE), in_map),   # x tile
                    pl.BlockSpec((2, s_blk, _LANE), in_map),      # combined-mask tile
                ],
                out_specs=pl.BlockSpec((1, 2, b_sz), lambda c, k: (c, 0, 0)),
                scratch_shapes=[pltpu.VMEM((2, b_sz, _LANE), jnp.float32)],
            ),
            compiler_params=pltpu.CompilerParams(
                dimension_semantics=("parallel", "arbitrary"),
                vmem_limit_bytes=vmem_limit_bytes,
            ),
        )(x3, m_kernel)

        y = jnp.sum(partial_out, axis=0).T                        # (B, 2)
        if tail is not None:
            y = y + tail
    return y + bias


if __name__ == "__main__":
    key = jax.random.PRNGKey(0)
    k_x, k_m, k_w, k_b, k_x2, k_m2, k_x3, k_m3 = jax.random.split(key, 8)

    def reference(x, masks, w, b):
        feat = x.reshape(x.shape[0], -1) @ (masks.reshape(2, -1) * 10.0).T
        return feat @ w.T + b

    # Deterministic stand-in for nn.Linear(2, 2) parameters.
    bound = 1.0 / jnp.sqrt(2.0)
    w = jax.random.uniform(k_w, (2, 2), minval=-bound, maxval=bound, dtype=jnp.float32)
    b = jax.random.uniform(k_b, (2,), minval=-bound, maxval=bound, dtype=jnp.float32)

    # --- Case 1: the shipped configuration (B=2, C=4, H=W=16 -> D=1024).
    B, C, H, W = 2, 4, 16, 16
    x = jax.random.normal(k_x, (B, C, H, W), dtype=jnp.float32)
    masks = jax.random.normal(k_m, (2, C, H, W), dtype=jnp.float32)  # stand-in masks.npy
    m_kernel, m_tail, bias = cinetv3_prepare_params(masks, w, b)
    y = jax.block_until_ready(cinetv3_forward(x, m_kernel, m_tail, bias))
    y_ref = reference(x, masks, w, b)
    assert jnp.allclose(y, y_ref, rtol=5e-4, atol=1e-2), (y, y_ref)

    # --- Case 2: non-128-aligned D + multiple K blocks + 2-way core split +
    #     ragged-block masking (tiny buffer budget forces 8-chunk K tiles).
    B2, D2 = 3, 9 * 128 + 50
    x2 = jax.random.normal(k_x2, (B2, D2), dtype=jnp.float32)
    masks2 = jax.random.normal(k_m2, (2, D2), dtype=jnp.float32)
    mk2, mt2, bias2 = cinetv3_prepare_params(masks2, w, b)
    y2 = jax.block_until_ready(
        cinetv3_forward(x2, mk2, mt2, bias2,
                        buffer_budget_bytes=2 * (B2 + 2) * 128 * 4 * 8))
    y2_ref = reference(x2, masks2, w, b)
    assert jnp.allclose(y2, y2_ref, rtol=5e-4, atol=1e-2), (y2, y2_ref)

    # --- Case 3: odd number of K blocks with the 2-way split (one all-padding
    #     grid step, exercised via the clamped index_map + in-kernel masking).
    B3, D3 = 4, 24 * 128
    x3 = jax.random.normal(k_x3, (B3, D3), dtype=jnp.float32)
    masks3 = jax.random.normal(k_m3, (2, D3), dtype=jnp.float32)
    mk3, mt3, bias3 = cinetv3_prepare_params(masks3, w, b)
    y3 = jax.block_until_ready(
        cinetv3_forward(x3, mk3, mt3, bias3,
                        buffer_budget_bytes=2 * (B3 + 2) * 128 * 4 * 8))
    y3_ref = reference(x3, masks3, w, b)
    assert jnp.allclose(y3, y3_ref, rtol=5e-4, atol=1e-2), (y3, y3_ref)

    print("KERNEL_OK")
</pallas_src>

<mosaic_0001>
module attributes {stable_mosaic.version = 11 : i64} {
  func.func @_cinet_kernel(%arg0: i32, %arg1: i32, %arg2: memref<2x8x128xf32, #tpu.memory_space<vmem>>, %arg3: memref<2x8x128xf32, #tpu.memory_space<vmem>>, %arg4: memref<1x2x2xf32, #tpu.memory_space<vmem>>, %arg5: memref<2x2x128xf32, #tpu.memory_space<vmem>>) attributes {dimension_semantics = [#tpu.dimension_semantics<parallel>, #tpu.dimension_semantics<arbitrary>], iteration_bounds = array<i64: 1, 1>, scalar_prefetch = 0 : i64, scratch_operands = 1 : i64, tpu.core_type = #tpu.core_type<tc>, window_params = [{transform_indices = @transform_0, window_bounds = array<i64: 2, 8, 128>}, {transform_indices = @transform_1, window_bounds = array<i64: 2, 8, 128>}, {transform_indices = @transform_2, window_bounds = array<i64: 1, 2, 2>}]} {
    %c0_i32 = arith.constant 0 : i32
    %0 = arith.cmpi eq, %arg1, %c0_i32 : i32
    %1 = arith.extui %0 : i1 to i32
    %c0_i32_0 = arith.constant 0 : i32
    %2 = arith.cmpi ne, %1, %c0_i32_0 : i32
    scf.if %2 {
      %cst_20 = arith.constant 0.000000e+00 : f32
      %32 = vector.broadcast %cst_20 : f32 to vector<2x2x128xf32>
      %c0_21 = arith.constant 0 : index
      %c0_22 = arith.constant 0 : index
      %c0_23 = arith.constant 0 : index
      %33 = vector.load %arg5[%c0_21, %c0_22, %c0_23] : memref<2x2x128xf32, #tpu.memory_space<vmem>>, vector<2x2x128xf32>
      tpu.vector_store %arg5[%c0_21, %c0_22, %c0_23], %32 {strides = array<i32>} : memref<2x2x128xf32, #tpu.memory_space<vmem>>, vector<2x2x128xf32>,
    } else {
    }
    %c0 = arith.constant 0 : index
    %c0_1 = arith.constant 0 : index
    %c0_2 = arith.constant 0 : index
    %3 = vector.load %arg2[%c0, %c0_1, %c0_2] : memref<2x8x128xf32, #tpu.memory_space<vmem>>, vector<2x8x128xf32>
    %c0_3 = arith.constant 0 : index
    %c0_4 = arith.constant 0 : index
    %c0_5 = arith.constant 0 : index
    %4 = vector.load %arg3[%c0_3, %c0_4, %c0_5] : memref<2x8x128xf32, #tpu.memory_space<vmem>>, vector<2x8x128xf32>
    %5 = vector.extract_strided_slice %4 {offsets = [0, 0, 0], sizes = [1, 8, 128], strides = [1, 1, 1]} : vector<2x8x128xf32> to vector<1x8x128xf32>
    %6 = vector.shape_cast %5 : vector<1x8x128xf32> to vector<8x128xf32>
    %7 = vector.shape_cast %6 : vector<8x128xf32> to vector<1x8x128xf32>
    %8 = vector.broadcast %7 : vector<1x8x128xf32> to vector<2x8x128xf32>
    %9 = arith.mulf %3, %8 : vector<2x8x128xf32>
    %c0_6 = arith.constant 0 : index
    %c0_7 = arith.constant 0 : index
    %c0_8 = arith.constant 0 : index
    %10 = vector.load %arg5[%c0_6, %c0_7, %c0_8] : memref<2x2x128xf32, #tpu.memory_space<vmem>>, vector<1x2x128xf32>
    %11 = vector.shape_cast %10 : vector<1x2x128xf32> to vector<2x128xf32>
    %cst = arith.constant dense<0.000000e+00> : vector<2x128xf32>
    %12 = vector.multi_reduction <add>, %9, %cst [1] : vector<2x8x128xf32> to vector<2x128xf32>
    %13 = arith.addf %11, %12 : vector<2x128xf32>
    %c0_9 = arith.constant 0 : index
    %c0_10 = arith.constant 0 : index
    %c0_11 = arith.constant 0 : index
    %14 = vector.load %arg5[%c0_9, %c0_10, %c0_11] : memref<2x2x128xf32, #tpu.memory_space<vmem>>, vector<1x2x128xf32>
    %15 = vector.shape_cast %14 : vector<1x2x128xf32> to vector<2x128xf32>
    %16 = vector.shape_cast %13 : vector<2x128xf32> to vector<1x2x128xf32>
    tpu.vector_store %arg5[%c0_9, %c0_10, %c0_11], %16 {strides = array<i32>} : memref<2x2x128xf32, #tpu.memory_space<vmem>>, vector<1x2x128xf32>,
    %17 = vector.extract_strided_slice %4 {offsets = [1, 0, 0], sizes = [1, 8, 128], strides = [1, 1, 1]} : vector<2x8x128xf32> to vector<1x8x128xf32>
    %18 = vector.shape_cast %17 : vector<1x8x128xf32> to vector<8x128xf32>
    %19 = vector.shape_cast %18 : vector<8x128xf32> to vector<1x8x128xf32>
    %20 = vector.broadcast %19 : vector<1x8x128xf32> to vector<2x8x128xf32>
    %21 = arith.mulf %3, %20 : vector<2x8x128xf32>
    %c1 = arith.constant 1 : index
    %c0_12 = arith.constant 0 : index
    %c0_13 = arith.constant 0 : index
    %22 = vector.load %arg5[%c1, %c0_12, %c0_13] : memref<2x2x128xf32, #tpu.memory_space<vmem>>, vector<1x2x128xf32>
    %23 = vector.shape_cast %22 : vector<1x2x128xf32> to vector<2x128xf32>
    %cst_14 = arith.constant dense<0.000000e+00> : vector<2x128xf32>
    %24 = vector.multi_reduction <add>, %21, %cst_14 [1] : vector<2x8x128xf32> to vector<2x128xf32>
    %25 = arith.addf %23, %24 : vector<2x128xf32>
    %c1_15 = arith.constant 1 : index
    %c0_16 = arith.constant 0 : index
    %c0_17 = arith.constant 0 : index
    %26 = vector.load %arg5[%c1_15, %c0_16, %c0_17] : memref<2x2x128xf32, #tpu.memory_space<vmem>>, vector<1x2x128xf32>
    %27 = vector.shape_cast %26 : vector<1x2x128xf32> to vector<2x128xf32>
    %28 = vector.shape_cast %25 : vector<2x128xf32> to vector<1x2x128xf32>
    tpu.vector_store %arg5[%c1_15, %c0_16, %c0_17], %28 {strides = array<i32>} : memref<2x2x128xf32, #tpu.memory_space<vmem>>, vector<1x2x128xf32>,
    %c0_i32_18 = arith.constant 0 : i32
    %29 = arith.cmpi eq, %arg1, %c0_i32_18 : i32
    %30 = arith.extui %29 : i1 to i32
    %c0_i32_19 = arith.constant 0 : i32
    %31 = arith.cmpi ne, %30, %c0_i32_19 : i32
    scf.if %31 {
      %c0_20 = arith.constant 0 : index
      %c0_21 = arith.constant 0 : index
      %c0_22 = arith.constant 0 : index
      %32 = vector.load %arg5[%c0_20, %c0_21, %c0_22] : memref<2x2x128xf32, #tpu.memory_space<vmem>>, vector<2x2x128xf32>
      %cst_23 = arith.constant dense<0.000000e+00> : vector<2x2xf32>
      %33 = vector.multi_reduction <add>, %32, %cst_23 [2] : vector<2x2x128xf32> to vector<2x2xf32>
      %c0_24 = arith.constant 0 : index
      %c0_25 = arith.constant 0 : index
      %c0_26 = arith.constant 0 : index
      %34 = vector.load %arg4[%c0_24, %c0_25, %c0_26] : memref<1x2x2xf32, #tpu.memory_space<vmem>>, vector<1x2x2xf32>
      %35 = vector.shape_cast %34 : vector<1x2x2xf32> to vector<2x2xf32>
      %36 = vector.shape_cast %33 : vector<2x2xf32> to vector<1x2x2xf32>
      tpu.vector_store %arg4[%c0_24, %c0_25, %c0_26], %36 {strides = array<i32>} : memref<1x2x2xf32, #tpu.memory_space<vmem>>, vector<1x2x2xf32>,
    } else {
    }
    return
  }
  func.func @transform_0(%arg0: i32, %arg1: i32) -> (i32, i32, i32) {
    %c1_i32 = arith.constant 1 : i32
    %0 = arith.muli %arg0, %c1_i32 : i32
    %1 = arith.addi %0, %arg1 : i32
    %c0_i32 = arith.constant 0 : i32
    %2 = arith.minsi %1, %c0_i32 : i32
    %c0_i32_0 = arith.constant 0 : i32
    %c0_i32_1 = arith.constant 0 : i32
    %c0_i32_2 = arith.constant 0 : i32
    return %c0_i32_0, %2, %c0_i32_1 : i32, i32, i32
  }
  func.func @transform_1(%arg0: i32, %arg1: i32) -> (i32, i32, i32) {
    %c1_i32 = arith.constant 1 : i32
    %0 = arith.muli %arg0, %c1_i32 : i32
    %1 = arith.addi %0, %arg1 : i32
    %c0_i32 = arith.constant 0 : i32
    %2 = arith.minsi %1, %c0_i32 : i32
    %c0_i32_0 = arith.constant 0 : i32
    %c0_i32_1 = arith.constant 0 : i32
    %c0_i32_2 = arith.constant 0 : i32
    return %c0_i32_0, %2, %c0_i32_1 : i32, i32, i32
  }
  func.func @transform_2(%arg0: i32, %arg1: i32) -> (i32, i32, i32) {
    %c0_i32 = arith.constant 0 : i32
    %c0_i32_0 = arith.constant 0 : i32
    %c0_i32_1 = arith.constant 0 : i32
    return %arg0, %c0_i32, %c0_i32_0 : i32, i32, i32
  }
}

</mosaic_0001>

<bundles_post_ra>
// kernel: tpu_custom_call.1
= control target key start
LH: loop header
LB: loop body
LE: loop exit
PB: predicated region body
PF: predicated region fallthrough
CT: control target
= control target key end

     0   :  { %7 = vsyncpa [#allocation4], 0  ;;  %s275_s0 = inlined_call_operand.hbm [shape: f32[2,8,128], index: 0, kind: input, shape index: {}]   ;;  %s276_s1 = inlined_call_operand.hbm [shape: f32[2,8,128], index: 1, kind: input, shape index: {}]   ;;  %s277_s2 = inlined_call_operand.hbm [shape: f32[1,2,2], index: 2, kind: output, shape index: {}]  }
   0x1   :  { %8 = vsyncpa [#allocation7], 0 }
   0x2   :  { %9 = vsyncpa [#allocation5], 0  ;;  %s19_s11 = sshll.u32 %s275_s0, 4  ;;  %s242_s12 = smov [#allocation3]   ;;  %s20_s11 = int_to_ptr.hbm [resolvable:$true] %s19_s11 }
   0x3   :  { %s21_s13 = sshll.u32 %s242_s12, 4  ;;  %s37_s16 = sshll.u32 %s276_s1, 4  ;;  %s22_s13 = int_to_ptr.vmem [resolvable:$true] %s21_s13  ;;  %s38_s16 = int_to_ptr.hbm [resolvable:$true] %s37_s16 }
   0x4   :  { %s243_s17 = smov 128   ;;  %s244_s18 = smov 8  }
   0x5   :  { %27 = dma.hbm_to_vmem [thread:$0]  %s20_s11, 256, %s22_s13, [#allocation4], %s243_s17, %s243_s17, %s244_s18  }
   0x6   :  { %s245_s19 = smov [#allocation6]  }
   0x7   :  { %s39_s20 = sshll.u32 %s245_s19, 4  ;;  %s40_s20 = int_to_ptr.vmem [resolvable:$true] %s39_s20 }
   0x8   :  { %45 = dma.hbm_to_vmem [thread:$0]  %s38_s16, 256, %s40_s20, [#allocation7], %s243_s17, %s243_s17, %s244_s18  }
   0x9   :  { %236 = dma.done.wait [#allocation4], 256  }
   0xa   :  { %237 = vsyncadd [#allocation4], 4294967040 }
   0xb   :  { %238 = dma.done.wait [#allocation7], 256  }
   0xc   :  { %239 = vsyncadd [#allocation7], 4294967040  ;;  %v246_v0 = vmov 0.0   ;;  %v66_v1 = vld [vmem:[#allocation3] sm:$0xff]  ;;  %v67_v2 = vld [vmem:[#allocation3 + $0x8] sm:$0xff]  ;;  %vm87_vm0 = vcmask 1041409   ;;  %v128_v44 = vlaneseq }
   0xd   :  { %64 = vst [vmem:[#allocation2] sm:$0x3] %v246_v0  ;;  %v68_v3 = vld [vmem:[#allocation6] sm:$0xff]  ;;  %v69_v6 = vld [vmem:[#allocation6 + $0x8] sm:$0xff]  ;;  %vm119_vm1 = vcmask 1041408   ;;  %s247_s0 = smov [#allocation8]  }
   0xe   :  { %65 = vst [vmem:[#allocation2 + $0x2] sm:$0x3] %v246_v0  ;;  %v70_v4 = vmul.f32 %v68_v3, %v66_v1  ;;  %v71_v5 = vmul.f32 %v68_v3, %v67_v2  ;;  %v92_v7 = vmul.f32 %v69_v6, %v66_v1  ;;  %v93_v8 = vmul.f32 %v69_v6, %v67_v2  ;;  %s141_s1 = sshll.u32 %s247_s0, 4  ;;  %s143_s23 = sshll.u32 %s277_s2, 4  ;;  %s142_s1 = int_to_ptr.vmem [resolvable:$true] %s141_s1  ;;  %s144_s23 = int_to_ptr.hbm [resolvable:$true] %s143_s23 }
   0xf   :  { %v129_v45 = vand.u32 127, %v128_v44  ;;  %vm134_vm2 = vcmask 9216  }
  0x10   :  { %v73_v9 = vrot.slane %v70_v4, 4  ;;  %v79_v10 = vrot.slane %v71_v5, 4  ;;  %v96_v11 = vrot.slane %v92_v7, 4  ;;  %v102_v12 = vrot.slane %v93_v8, 4 }
  0x12   :  { %v74_v13 = vadd.f32 %v73_v9, %v70_v4  ;;  %v80_v14 = vadd.f32 %v79_v10, %v71_v5  ;;  %v97_v15 = vadd.f32 %v96_v11, %v92_v7  ;;  %v103_v16 = vadd.f32 %v102_v12, %v93_v8 }
  0x14   :  { %v75_v17 = vrot.slane %v74_v13, 2  ;;  %v81_v18 = vrot.slane %v80_v14, 2  ;;  %v98_v19 = vrot.slane %v97_v15, 2  ;;  %v104_v20 = vrot.slane %v103_v16, 2  ;;  %v72_v29 = vld [vmem:[#allocation2] sm:$0x3] }
  0x15   :  { %v95_v32 = vld [vmem:[#allocation2 + $0x2] sm:$0x3] }
  0x16   :  { %v76_v21 = vadd.f32 %v75_v17, %v74_v13  ;;  %v82_v22 = vadd.f32 %v81_v18, %v80_v14  ;;  %v99_v23 = vadd.f32 %v98_v19, %v97_v15  ;;  %v105_v24 = vadd.f32 %v104_v20, %v103_v16 }
  0x18   :  { %v77_v25 = vrot.slane %v76_v21, 1  ;;  %v83_v26 = vrot.slane %v82_v22, 1  ;;  %v100_v27 = vrot.slane %v99_v23, 1  ;;  %v106_v28 = vrot.slane %v105_v24, 1 }
  0x1a   :  { %v78_v30 = vadd.f32 %v77_v25, %v76_v21  ;;  %v84_v31 = vadd.f32 %v83_v26, %v82_v22  ;;  %v101_v33 = vadd.f32 %v100_v27, %v99_v23  ;;  %v107_v34 = vadd.f32 %v106_v28, %v105_v24 }
  0x1c   :  { %v88_v35 = vsel %vm87_vm0, %v84_v31, %v78_v30  ;;  %v110_v37 = vsel %vm87_vm0, %v107_v34, %v101_v33 }
  0x1d   :  { %v90_v36 = vadd.f32 %v88_v35, %v72_v29  ;;  %v112_v38 = vadd.f32 %v110_v37, %v95_v32 }
  0x1f   :  { %91 = vst [vmem:[#allocation2] sm:$0x3] %v90_v36 }
  0x20   :  { %113 = vst [vmem:[#allocation2 + $0x2] sm:$0x3] %v112_v38 }
  0x26   :  { %v117_v39 = vld [vmem:[#allocation2] sm:$0x3] }
  0x27   :  { %v120_v40 = vsel %vm119_vm1, %v117_v39, 0.0  ;;  %v118_v41 = vld [vmem:[#allocation2 + $0x2] sm:$0x3] }
  0x28   :  { %121 = vadd.xlane.f32.xlu0 %v120_v40  ;;  %v123_v42 = vsel %vm119_vm1, %v118_v41, 0.0 }
  0x30   :  { %124 = vadd.xlane.f32.xlu0 %v123_v42 }
  0x9b   :  { %v122_v43 = vpop.xlane.xlu0 %121 }
  0x9c   :  { %v130_v47 = vperm.slane %v122_v43, %v129_v45 }
  0xa3   :  { %v125_v46 = vpop.xlane.xlu0 %124 }
  0xa4   :  { %v131_v48 = vperm.slane %v125_v46, %v129_v45 }
  0xa6   :  { %v132_v49 = vsel %vm87_vm0, %v131_v48, %v130_v47 }
  0xa7   :  { %135 = vst.msk [vmem:[#allocation8] sm:$0x3] %vm134_vm2, %v132_v49 }
  0xa8   :  { %146 = dma.vmem_to_hbm [thread:$0]  %s142_s1, 32, %s144_s23, [#allocation5]  }
  0xa9   :  { %240 = dma.done.wait [#allocation5], 32  }
  0xaa   :  { %241 = vsyncadd [#allocation5], 4294967264 }
  0xab   :  { %151 = vsyncpa [#allocation4], 1 }
  0xac   :  { %152 = vsyncpa [#allocation7], 1 }
  0xad   :  { %153 = vsyncpa [#allocation5], 1 }

</bundles_post_ra>
